<compile_context>
chip_gen: v5e
topology: v5e:2x2
jax: 0.10.0
libtpu: 0.0.40
codegen_flags: <defaults>
</compile_context>

<pallas_src>
import functools

import jax
import jax.numpy as jnp
from jax import lax
from jax.experimental import pallas as pl
from jax.experimental.pallas import tpu as pltpu

_LANE = 128


# ----------------------------------------------------------------------------
# tiling helpers
# ----------------------------------------------------------------------------
def _vmem_capacity_bytes():
    """Trace-time VMEM query with a conservative fallback."""
    try:
        return int(pltpu.get_tpu_info().vmem_capacity_bytes)
    except Exception:                     # unknown chip / query unavailable
        return 64 * 1024 * 1024


def _pick_tiling(M):
    """Return (cells_per_block, num_blocks, vmem_limit_bytes)."""
    vmem = _vmem_capacity_bytes()
    if vmem >= 100 * 1024 * 1024:         # v5e / v6e: 128 MiB physical VMEM
        max_cells, vmem_limit = 8192, 80 * 1024 * 1024
    else:                                  # v7x (64 MiB per TC) or unknown
        max_cells, vmem_limit = 4096, 48 * 1024 * 1024

    if M <= 2 * _LANE:
        # One exact block (block dims == full array dims -> no OOB rows).
        return M, 1, vmem_limit

    # >= 2 blocks so both v7x TensorCores get work.  blk must be a multiple of
    # 128 (lane constraint of the (1, M) mask view) and of 8 (sublane
    # constraint of the (M, C) views).  The last block may be ragged; the
    # kernel masks it with an iota-vs-M test.
    blk = min(max_cells, pl.cdiv(pl.cdiv(M, 2), _LANE) * _LANE)
    return blk, pl.cdiv(M, blk), vmem_limit


# ----------------------------------------------------------------------------
# kernel
# ----------------------------------------------------------------------------
def _yolo_loss_kernel(pred_ref, tbox_ref, tcls_ref, mask_ref, out_ref, *,
                      S, B, l_coord, l_noobj, M, blk):
    """One grid step processes `blk` grid cells.

    pred_ref : (blk, 5*B+20)  raw predictions      [x,y,w,h,conf]*B + 20 cls
    tbox_ref : (blk, 4)       target boxes         [x,y,w,h]
    tcls_ref : (blk, 20)      target classes
    mask_ref : (1, blk)       has-object mask (float 0/1), lane-major view
    out_ref  : (1, 4, 128)    per-block partial losses (scalar bcast on lanes)
               row 0: cls, 1: no-obj, 2: reg, 3: contain
    """
    i = pl.program_id(0)
    inv_S = jnp.float32(1.0 / S)
    half = jnp.float32(0.5)

    # ---- validity / object masks (ragged-tail & garbage safe) --------------
    lane = lax.broadcasted_iota(jnp.int32, (1, blk), 1)
    valid = (lane + i * blk) < M                         # (1, blk) bool
    m = mask_ref[...]                                    # (1, blk) f32
    obj = jnp.logical_and(valid, m > 0.5)
    noobj = jnp.logical_and(valid, m <= 0.5)

    # ---- channel-major rows via in-kernel XLU transposes --------------------
    # (kernel is HBM/DMA-bound; the transpose rides the otherwise idle XLU)
    predT = jnp.transpose(pred_ref[...])                 # (5B+20, blk)
    tbT = jnp.transpose(tbox_ref[...])                   # (4, blk)
    tclsT = jnp.transpose(tcls_ref[...])                 # (20, blk)

    # ---------------- class prediction loss ----------------
    dcls = tclsT - predT[5 * B:5 * B + 20]               # (20, blk)
    cls_se = jnp.sum(dcls * dcls, axis=0, keepdims=True)  # (1, blk)
    cls_loss = jnp.sum(jnp.where(obj, cls_se, 0.0))

    # ---------------- target box -> xyxy ----------------
    tx = tbT[0:1] * inv_S
    ty = tbT[1:2] * inv_S
    tw = tbT[2:3]
    th = tbT[3:4]
    tx1 = tx - half * tw
    ty1 = ty - half * th
    tx2 = tx + half * tw
    ty2 = ty + half * th
    t_area = (tx2 - tx1) * (ty2 - ty1)

    def iou_with_target(pbox):            # pbox: (>=4, blk), rows 0..3 = xywh
        px = pbox[0:1] * inv_S
        py = pbox[1:2] * inv_S
        pw = pbox[2:3]
        ph = pbox[3:4]
        px1 = px - half * pw
        py1 = py - half * ph
        px2 = px + half * pw
        py2 = py + half * ph
        p_area = (px2 - px1) * (py2 - py1)
        iw = jnp.maximum(jnp.minimum(tx2, px2) - jnp.maximum(tx1, px1), 0.0)
        ih = jnp.maximum(jnp.minimum(ty2, py2) - jnp.maximum(ty1, py1), 0.0)
        inter = iw * ih
        # exact division (EUP); matches the PyTorch reference (no eps)
        return inter / (t_area + p_area - inter)

    # ---- best-of-B (first index wins ties) + fused no-object conf ----------
    best_box = predT[0:5]                                 # (5, blk)
    best_iou = iou_with_target(best_box)
    conf_sq = best_box[4:5] * best_box[4:5]
    for b in range(1, B):
        cand = predT[b * 5:b * 5 + 5]                     # (5, blk)
        conf_sq = conf_sq + cand[4:5] * cand[4:5]
        iou_b = iou_with_target(cand)
        better = iou_b > best_iou                         # (1, blk)
        best_iou = jnp.where(better, iou_b, best_iou)
        best_box = jnp.where(better, cand, best_box)      # bcast over 5 rows

    no_obj_loss = l_noobj * jnp.sum(jnp.where(noobj, conf_sq, 0.0))

    # ---------------- regression loss (object cells only) -------------------
    # sqrt is NOT clamped, matching PyTorch (NaN on negative w/h propagates
    # only for real object cells; masked lanes are select-killed).
    reg_xy = (best_box[0:1] - tbT[0:1]) ** 2 + (best_box[1:2] - tbT[1:2]) ** 2
    reg_wh = ((jnp.sqrt(best_box[2:3]) - jnp.sqrt(tbT[2:3])) ** 2 +
              (jnp.sqrt(best_box[3:4]) - jnp.sqrt(tbT[3:4])) ** 2)
    reg_loss = l_coord * jnp.sum(jnp.where(obj, reg_xy + reg_wh, 0.0))

    # ---------------- containing-object confidence loss ---------------------
    contain = (best_iou - best_box[4:5]) ** 2
    contain_loss = jnp.sum(jnp.where(obj, contain, 0.0))

    # ---------------- lane-dense (4, 128) partial-loss store ----------------
    row = lax.broadcasted_iota(jnp.int32, (4, _LANE), 0)
    part = jnp.where(row == 0, cls_loss,
           jnp.where(row == 1, no_obj_loss,
           jnp.where(row == 2, reg_loss, contain_loss)))
    out_ref[0] = part


# ----------------------------------------------------------------------------
# wrapper (everything inside one jit: views, pallas_call, reduce, /N)
# ----------------------------------------------------------------------------
@functools.lru_cache(maxsize=None)
def _build_yolo_loss(S, B, l_coord, l_noobj):
    C = B * 5 + 20

    @jax.jit
    def run(pred_tensor, target_boxes, target_cls, has_object_map):
        N = pred_tensor.shape[0]
        M = pred_tensor.shape[0] * pred_tensor.shape[1] * pred_tensor.shape[2]
        blk, num_blocks, vmem_limit = _pick_tiling(M)

        # Free, contiguous views of the raw inputs (no repack, no pad).
        pred2d = pred_tensor.reshape(M, C).astype(jnp.float32)
        tbox2d = target_boxes.reshape(M, 4).astype(jnp.float32)
        tcls2d = target_cls.reshape(M, 20).astype(jnp.float32)
        mask_row = has_object_map.reshape(1, M).astype(jnp.float32)

        kernel = functools.partial(_yolo_loss_kernel, S=S, B=B,
                                   l_coord=float(l_coord),
                                   l_noobj=float(l_noobj), M=M, blk=blk)

        partials = pl.pallas_call(
            kernel,
            out_shape=jax.ShapeDtypeStruct((num_blocks, 4, _LANE), jnp.float32),
            grid_spec=pltpu.PrefetchScalarGridSpec(
                num_scalar_prefetch=0,
                grid=(num_blocks,),
                in_specs=[pl.BlockSpec((blk, C), lambda i: (i, 0)),
                          pl.BlockSpec((blk, 4), lambda i: (i, 0)),
                          pl.BlockSpec((blk, 20), lambda i: (i, 0)),
                          pl.BlockSpec((1, blk), lambda i: (0, i))],
                out_specs=pl.BlockSpec((1, 4, _LANE), lambda i: (i, 0, 0)),
            ),
            compiler_params=pltpu.CompilerParams(
                dimension_semantics=("parallel",),     # megacore-splittable
                vmem_limit_bytes=vmem_limit),
        )(pred2d, tbox2d, tcls2d, mask_row)

        losses = jnp.sum(partials[:, :, 0], axis=0)        # (4,)
        cls_loss, no_obj_loss, reg_loss, contain_loss = (
            losses[0], losses[1], losses[2], losses[3])
        total_loss = (cls_loss + no_obj_loss + reg_loss + contain_loss) / N
        return dict(total_loss=total_loss, reg_loss=reg_loss,
                    containing_obj_loss=contain_loss, no_obj_loss=no_obj_loss,
                    cls_loss=cls_loss)

    return run


def yolo_loss(pred_tensor, target_boxes, target_cls, has_object_map, *,
              S, B, l_coord, l_noobj):
    """pred_tensor (N,S,S,B*5+20), target_boxes (N,S,S,4), target_cls
    (N,S,S,20), has_object_map (N,S,S) bool -> dict of scalar losses
    (same keys / semantics as the PyTorch module)."""
    run = _build_yolo_loss(int(S), int(B), float(l_coord), float(l_noobj))
    return run(pred_tensor, target_boxes, target_cls, has_object_map)


# ----------------------------------------------------------------------------
# plain-JAX reference (same math as the PyTorch forward, masked-sum form)
# ----------------------------------------------------------------------------
def yolo_loss_ref(pred_tensor, target_boxes, target_cls, has_object_map, *,
                  S, B, l_coord, l_noobj):
    N = pred_tensor.shape[0]
    mask = has_object_map.astype(jnp.float32)
    pred_cls = pred_tensor[..., B * 5:]
    cls_loss = jnp.sum(mask * jnp.sum((target_cls - pred_cls) ** 2, axis=-1))

    no_obj = 0.0
    for b in range(B):
        conf = pred_tensor[..., b * 5 + 4]
        no_obj += jnp.sum((1.0 - mask) * conf ** 2)
    no_obj_loss = l_noobj * no_obj

    def xyxy(box):
        x = box[..., 0] / S
        y = box[..., 1] / S
        w = box[..., 2]
        h = box[..., 3]
        return jnp.stack([x - 0.5 * w, y - 0.5 * h, x + 0.5 * w, y + 0.5 * h], -1)

    t = xyxy(target_boxes)
    t_area = (t[..., 2] - t[..., 0]) * (t[..., 3] - t[..., 1])
    ious = []
    for b in range(B):
        p = xyxy(pred_tensor[..., b * 5:b * 5 + 4])
        p_area = (p[..., 2] - p[..., 0]) * (p[..., 3] - p[..., 1])
        lt = jnp.maximum(t[..., :2], p[..., :2])
        rb = jnp.minimum(t[..., 2:], p[..., 2:])
        wh = jnp.maximum(rb - lt, 0.0)
        inter = wh[..., 0] * wh[..., 1]
        ious.append(inter / (t_area + p_area - inter))
    ious = jnp.stack(ious, axis=-1)
    best_idx = jnp.argmax(ious, axis=-1)
    best_iou = jnp.max(ious, axis=-1)
    boxes = jnp.stack([pred_tensor[..., b * 5:(b + 1) * 5] for b in range(B)], -2)
    best_box = jnp.take_along_axis(boxes, best_idx[..., None, None], axis=-2)[..., 0, :]
    reg = ((best_box[..., 0] - target_boxes[..., 0]) ** 2 +
           (best_box[..., 1] - target_boxes[..., 1]) ** 2 +
           (jnp.sqrt(best_box[..., 2]) - jnp.sqrt(target_boxes[..., 2])) ** 2 +
           (jnp.sqrt(best_box[..., 3]) - jnp.sqrt(target_boxes[..., 3])) ** 2)
    reg_loss = l_coord * jnp.sum(jnp.where(has_object_map, reg, 0.0))
    contain_loss = jnp.sum(jnp.where(has_object_map,
                                     (best_iou - best_box[..., 4]) ** 2, 0.0))
    total = (cls_loss + no_obj_loss + reg_loss + contain_loss) / N
    return dict(total_loss=total, reg_loss=reg_loss,
                containing_obj_loss=contain_loss, no_obj_loss=no_obj_loss,
                cls_loss=cls_loss)


if __name__ == "__main__":
    S, B = 7, 2
    l_coord, l_noobj = 5.0, 0.5

    def make_inputs(key, N):
        k1, k2, k3, k4 = jax.random.split(key, 4)
        # keep box params in (0,1) so sqrt(w), sqrt(h) are well defined
        pred = jax.random.uniform(k1, (N, S, S, B * 5 + 20), jnp.float32, 0.05, 0.95)
        tbox = jax.random.uniform(k2, (N, S, S, 4), jnp.float32, 0.05, 0.95)
        tcls = jax.random.uniform(k3, (N, S, S, 20), jnp.float32)
        hmap = jax.random.bernoulli(k4, 0.3, (N, S, S))
        return pred, tbox, tcls, hmap

    key = jax.random.PRNGKey(0)
    k_small, k_big = jax.random.split(key)

    cases = (
        (make_inputs(k_small, 2), "N=2 single-block"),
        (make_inputs(k_big, 6), "N=6 multi-block ragged-tail"),
    )
    for args, name in cases:
        out = yolo_loss(*args, S=S, B=B, l_coord=l_coord, l_noobj=l_noobj)
        jax.block_until_ready(out["total_loss"])
        ref = yolo_loss_ref(*args, S=S, B=B, l_coord=l_coord, l_noobj=l_noobj)
        for kname in out:
            assert jnp.allclose(out[kname], ref[kname], rtol=1e-3, atol=1e-3), \
                (name, kname, out[kname], ref[kname])

    print("KERNEL_OK")
</pallas_src>

<mosaic_0001>
module attributes {stable_mosaic.version = 11 : i64} {
  func.func @_yolo_loss_kernel(%arg0: i32, %arg1: memref<98x30xf32, #tpu.memory_space<vmem>>, %arg2: memref<98x4xf32, #tpu.memory_space<vmem>>, %arg3: memref<98x20xf32, #tpu.memory_space<vmem>>, %arg4: memref<1x98xf32, #tpu.memory_space<vmem>>, %arg5: memref<1x4x128xf32, #tpu.memory_space<vmem>>) attributes {dimension_semantics = [#tpu.dimension_semantics<parallel>], iteration_bounds = array<i64: 1>, scalar_prefetch = 0 : i64, scratch_operands = 0 : i64, tpu.core_type = #tpu.core_type<tc>, window_params = [{transform_indices = @transform_0, window_bounds = array<i64: 98, 30>}, {transform_indices = @transform_1, window_bounds = array<i64: 98, 4>}, {transform_indices = @transform_2, window_bounds = array<i64: 98, 20>}, {transform_indices = @transform_3, window_bounds = array<i64: 1, 98>}, {transform_indices = @transform_4, window_bounds = array<i64: 1, 4, 128>}]} {
    %0 = tpu.iota {dimensions = array<i32: 1>} : vector<1x98xi32>
    %c98_i32 = arith.constant 98 : i32
    %1 = arith.muli %arg0, %c98_i32 : i32
    %2 = vector.broadcast %1 : i32 to vector<1x98xi32>
    %3 = arith.addi %0, %2 : vector<1x98xi32>
    %c98_i32_0 = arith.constant 98 : i32
    %4 = vector.broadcast %c98_i32_0 : i32 to vector<1x98xi32>
    %5 = arith.cmpi slt, %3, %4 : vector<1x98xi32>
    %c0 = arith.constant 0 : index
    %c0_1 = arith.constant 0 : index
    %6 = vector.load %arg4[%c0, %c0_1] : memref<1x98xf32, #tpu.memory_space<vmem>>, vector<1x98xf32>
    %cst = arith.constant 5.000000e-01 : f32
    %7 = vector.broadcast %cst : f32 to vector<1x98xf32>
    %8 = arith.cmpf ogt, %6, %7 : vector<1x98xf32>
    %9 = arith.andi %5, %8 : vector<1x98xi1>
    %cst_2 = arith.constant 5.000000e-01 : f32
    %10 = vector.broadcast %cst_2 : f32 to vector<1x98xf32>
    %11 = arith.cmpf ole, %6, %10 : vector<1x98xf32>
    %12 = arith.andi %5, %11 : vector<1x98xi1>
    %c0_3 = arith.constant 0 : index
    %c0_4 = arith.constant 0 : index
    %13 = vector.load %arg1[%c0_3, %c0_4] : memref<98x30xf32, #tpu.memory_space<vmem>>, vector<98x30xf32>
    %14 = tpu.transpose %13, [1, 0] : vector<98x30xf32> -> vector<30x98xf32>
    %c0_5 = arith.constant 0 : index
    %c0_6 = arith.constant 0 : index
    %15 = vector.load %arg2[%c0_5, %c0_6] : memref<98x4xf32, #tpu.memory_space<vmem>>, vector<98x4xf32>
    %16 = tpu.transpose %15, [1, 0] : vector<98x4xf32> -> vector<4x98xf32>
    %c0_7 = arith.constant 0 : index
    %c0_8 = arith.constant 0 : index
    %17 = vector.load %arg3[%c0_7, %c0_8] : memref<98x20xf32, #tpu.memory_space<vmem>>, vector<98x20xf32>
    %18 = tpu.transpose %17, [1, 0] : vector<98x20xf32> -> vector<20x98xf32>
    %19 = vector.extract_strided_slice %14 {offsets = [10, 0], sizes = [20, 98], strides = [1, 1]} : vector<30x98xf32> to vector<20x98xf32>
    %20 = arith.subf %18, %19 : vector<20x98xf32>
    %21 = arith.mulf %20, %20 : vector<20x98xf32>
    %cst_9 = arith.constant dense<0.000000e+00> : vector<98xf32>
    %22 = vector.multi_reduction <add>, %21, %cst_9 [0] : vector<20x98xf32> to vector<98xf32>
    %23 = vector.shape_cast %22 : vector<98xf32> to vector<1x98xf32>
    %cst_10 = arith.constant 0.000000e+00 : f32
    %24 = vector.broadcast %cst_10 : f32 to vector<1x98xf32>
    %25 = arith.select %9, %23, %24 : vector<1x98xi1>, vector<1x98xf32>
    %26 = vector.shape_cast %25 : vector<1x98xf32> to vector<1x1x98xf32>
    %cst_11 = arith.constant dense<0.000000e+00> : vector<1xf32>
    %27 = vector.multi_reduction <add>, %26, %cst_11 [1, 2] : vector<1x1x98xf32> to vector<1xf32>
    %28 = vector.shape_cast %27 : vector<1xf32> to vector<1x1x1xf32>
    %29 = vector.extract %28[0, 0, 0] : f32 from vector<1x1x1xf32>
    %30 = vector.extract_strided_slice %16 {offsets = [0, 0], sizes = [1, 98], strides = [1, 1]} : vector<4x98xf32> to vector<1x98xf32>
    %cst_12 = arith.constant 0.142857149 : f32
    %31 = vector.broadcast %cst_12 : f32 to vector<1x98xf32>
    %32 = arith.mulf %30, %31 : vector<1x98xf32>
    %33 = vector.extract_strided_slice %16 {offsets = [1, 0], sizes = [1, 98], strides = [1, 1]} : vector<4x98xf32> to vector<1x98xf32>
    %cst_13 = arith.constant 0.142857149 : f32
    %34 = vector.broadcast %cst_13 : f32 to vector<1x98xf32>
    %35 = arith.mulf %33, %34 : vector<1x98xf32>
    %36 = vector.extract_strided_slice %16 {offsets = [2, 0], sizes = [1, 98], strides = [1, 1]} : vector<4x98xf32> to vector<1x98xf32>
    %37 = vector.extract_strided_slice %16 {offsets = [3, 0], sizes = [1, 98], strides = [1, 1]} : vector<4x98xf32> to vector<1x98xf32>
    %cst_14 = arith.constant 5.000000e-01 : f32
    %38 = vector.broadcast %cst_14 : f32 to vector<1x98xf32>
    %39 = arith.mulf %38, %36 : vector<1x98xf32>
    %40 = arith.subf %32, %39 : vector<1x98xf32>
    %cst_15 = arith.constant 5.000000e-01 : f32
    %41 = vector.broadcast %cst_15 : f32 to vector<1x98xf32>
    %42 = arith.mulf %41, %37 : vector<1x98xf32>
    %43 = arith.subf %35, %42 : vector<1x98xf32>
    %cst_16 = arith.constant 5.000000e-01 : f32
    %44 = vector.broadcast %cst_16 : f32 to vector<1x98xf32>
    %45 = arith.mulf %44, %36 : vector<1x98xf32>
    %46 = arith.addf %32, %45 : vector<1x98xf32>
    %cst_17 = arith.constant 5.000000e-01 : f32
    %47 = vector.broadcast %cst_17 : f32 to vector<1x98xf32>
    %48 = arith.mulf %47, %37 : vector<1x98xf32>
    %49 = arith.addf %35, %48 : vector<1x98xf32>
    %50 = arith.subf %46, %40 : vector<1x98xf32>
    %51 = arith.subf %49, %43 : vector<1x98xf32>
    %52 = arith.mulf %50, %51 : vector<1x98xf32>
    %53 = vector.extract_strided_slice %14 {offsets = [0, 0], sizes = [5, 98], strides = [1, 1]} : vector<30x98xf32> to vector<5x98xf32>
    %54 = vector.extract_strided_slice %53 {offsets = [0, 0], sizes = [1, 98], strides = [1, 1]} : vector<5x98xf32> to vector<1x98xf32>
    %cst_18 = arith.constant 0.142857149 : f32
    %55 = vector.broadcast %cst_18 : f32 to vector<1x98xf32>
    %56 = arith.mulf %54, %55 : vector<1x98xf32>
    %57 = vector.extract_strided_slice %53 {offsets = [1, 0], sizes = [1, 98], strides = [1, 1]} : vector<5x98xf32> to vector<1x98xf32>
    %cst_19 = arith.constant 0.142857149 : f32
    %58 = vector.broadcast %cst_19 : f32 to vector<1x98xf32>
    %59 = arith.mulf %57, %58 : vector<1x98xf32>
    %60 = vector.extract_strided_slice %53 {offsets = [2, 0], sizes = [1, 98], strides = [1, 1]} : vector<5x98xf32> to vector<1x98xf32>
    %61 = vector.extract_strided_slice %53 {offsets = [3, 0], sizes = [1, 98], strides = [1, 1]} : vector<5x98xf32> to vector<1x98xf32>
    %cst_20 = arith.constant 5.000000e-01 : f32
    %62 = vector.broadcast %cst_20 : f32 to vector<1x98xf32>
    %63 = arith.mulf %62, %60 : vector<1x98xf32>
    %64 = arith.subf %56, %63 : vector<1x98xf32>
    %cst_21 = arith.constant 5.000000e-01 : f32
    %65 = vector.broadcast %cst_21 : f32 to vector<1x98xf32>
    %66 = arith.mulf %65, %61 : vector<1x98xf32>
    %67 = arith.subf %59, %66 : vector<1x98xf32>
    %cst_22 = arith.constant 5.000000e-01 : f32
    %68 = vector.broadcast %cst_22 : f32 to vector<1x98xf32>
    %69 = arith.mulf %68, %60 : vector<1x98xf32>
    %70 = arith.addf %56, %69 : vector<1x98xf32>
    %cst_23 = arith.constant 5.000000e-01 : f32
    %71 = vector.broadcast %cst_23 : f32 to vector<1x98xf32>
    %72 = arith.mulf %71, %61 : vector<1x98xf32>
    %73 = arith.addf %59, %72 : vector<1x98xf32>
    %74 = arith.subf %70, %64 : vector<1x98xf32>
    %75 = arith.subf %73, %67 : vector<1x98xf32>
    %76 = arith.mulf %74, %75 : vector<1x98xf32>
    %77 = arith.minimumf %46, %70 : vector<1x98xf32>
    %78 = arith.maximumf %40, %64 : vector<1x98xf32>
    %79 = arith.subf %77, %78 : vector<1x98xf32>
    %cst_24 = arith.constant 0.000000e+00 : f32
    %80 = vector.broadcast %cst_24 : f32 to vector<1x98xf32>
    %81 = arith.maximumf %79, %80 : vector<1x98xf32>
    %82 = arith.minimumf %49, %73 : vector<1x98xf32>
    %83 = arith.maximumf %43, %67 : vector<1x98xf32>
    %84 = arith.subf %82, %83 : vector<1x98xf32>
    %cst_25 = arith.constant 0.000000e+00 : f32
    %85 = vector.broadcast %cst_25 : f32 to vector<1x98xf32>
    %86 = arith.maximumf %84, %85 : vector<1x98xf32>
    %87 = arith.mulf %81, %86 : vector<1x98xf32>
    %88 = arith.addf %52, %76 : vector<1x98xf32>
    %89 = arith.subf %88, %87 : vector<1x98xf32>
    %90 = arith.divf %87, %89 : vector<1x98xf32>
    %91 = vector.extract_strided_slice %53 {offsets = [4, 0], sizes = [1, 98], strides = [1, 1]} : vector<5x98xf32> to vector<1x98xf32>
    %92 = vector.extract_strided_slice %53 {offsets = [4, 0], sizes = [1, 98], strides = [1, 1]} : vector<5x98xf32> to vector<1x98xf32>
    %93 = arith.mulf %91, %92 : vector<1x98xf32>
    %94 = vector.extract_strided_slice %14 {offsets = [5, 0], sizes = [5, 98], strides = [1, 1]} : vector<30x98xf32> to vector<5x98xf32>
    %95 = vector.extract_strided_slice %94 {offsets = [4, 0], sizes = [1, 98], strides = [1, 1]} : vector<5x98xf32> to vector<1x98xf32>
    %96 = vector.extract_strided_slice %94 {offsets = [4, 0], sizes = [1, 98], strides = [1, 1]} : vector<5x98xf32> to vector<1x98xf32>
    %97 = arith.mulf %95, %96 : vector<1x98xf32>
    %98 = arith.addf %93, %97 : vector<1x98xf32>
    %99 = vector.extract_strided_slice %94 {offsets = [0, 0], sizes = [1, 98], strides = [1, 1]} : vector<5x98xf32> to vector<1x98xf32>
    %cst_26 = arith.constant 0.142857149 : f32
    %100 = vector.broadcast %cst_26 : f32 to vector<1x98xf32>
    %101 = arith.mulf %99, %100 : vector<1x98xf32>
    %102 = vector.extract_strided_slice %94 {offsets = [1, 0], sizes = [1, 98], strides = [1, 1]} : vector<5x98xf32> to vector<1x98xf32>
    %cst_27 = arith.constant 0.142857149 : f32
    %103 = vector.broadcast %cst_27 : f32 to vector<1x98xf32>
    %104 = arith.mulf %102, %103 : vector<1x98xf32>
    %105 = vector.extract_strided_slice %94 {offsets = [2, 0], sizes = [1, 98], strides = [1, 1]} : vector<5x98xf32> to vector<1x98xf32>
    %106 = vector.extract_strided_slice %94 {offsets = [3, 0], sizes = [1, 98], strides = [1, 1]} : vector<5x98xf32> to vector<1x98xf32>
    %cst_28 = arith.constant 5.000000e-01 : f32
    %107 = vector.broadcast %cst_28 : f32 to vector<1x98xf32>
    %108 = arith.mulf %107, %105 : vector<1x98xf32>
    %109 = arith.subf %101, %108 : vector<1x98xf32>
    %cst_29 = arith.constant 5.000000e-01 : f32
    %110 = vector.broadcast %cst_29 : f32 to vector<1x98xf32>
    %111 = arith.mulf %110, %106 : vector<1x98xf32>
    %112 = arith.subf %104, %111 : vector<1x98xf32>
    %cst_30 = arith.constant 5.000000e-01 : f32
    %113 = vector.broadcast %cst_30 : f32 to vector<1x98xf32>
    %114 = arith.mulf %113, %105 : vector<1x98xf32>
    %115 = arith.addf %101, %114 : vector<1x98xf32>
    %cst_31 = arith.constant 5.000000e-01 : f32
    %116 = vector.broadcast %cst_31 : f32 to vector<1x98xf32>
    %117 = arith.mulf %116, %106 : vector<1x98xf32>
    %118 = arith.addf %104, %117 : vector<1x98xf32>
    %119 = arith.subf %115, %109 : vector<1x98xf32>
    %120 = arith.subf %118, %112 : vector<1x98xf32>
    %121 = arith.mulf %119, %120 : vector<1x98xf32>
    %122 = arith.minimumf %46, %115 : vector<1x98xf32>
    %123 = arith.maximumf %40, %109 : vector<1x98xf32>
    %124 = arith.subf %122, %123 : vector<1x98xf32>
    %cst_32 = arith.constant 0.000000e+00 : f32
    %125 = vector.broadcast %cst_32 : f32 to vector<1x98xf32>
    %126 = arith.maximumf %124, %125 : vector<1x98xf32>
    %127 = arith.minimumf %49, %118 : vector<1x98xf32>
    %128 = arith.maximumf %43, %112 : vector<1x98xf32>
    %129 = arith.subf %127, %128 : vector<1x98xf32>
    %cst_33 = arith.constant 0.000000e+00 : f32
    %130 = vector.broadcast %cst_33 : f32 to vector<1x98xf32>
    %131 = arith.maximumf %129, %130 : vector<1x98xf32>
    %132 = arith.mulf %126, %131 : vector<1x98xf32>
    %133 = arith.addf %52, %121 : vector<1x98xf32>
    %134 = arith.subf %133, %132 : vector<1x98xf32>
    %135 = arith.divf %132, %134 : vector<1x98xf32>
    %136 = arith.cmpf ogt, %135, %90 : vector<1x98xf32>
    %137 = arith.select %136, %135, %90 : vector<1x98xi1>, vector<1x98xf32>
    %138 = vector.shape_cast %136 : vector<1x98xi1> to vector<1x98xi1>
    %139 = vector.broadcast %138 : vector<1x98xi1> to vector<5x98xi1>
    %140 = arith.select %139, %94, %53 : vector<5x98xi1>, vector<5x98xf32>
    %cst_34 = arith.constant 0.000000e+00 : f32
    %141 = vector.broadcast %cst_34 : f32 to vector<1x98xf32>
    %142 = arith.select %12, %98, %141 : vector<1x98xi1>, vector<1x98xf32>
    %143 = vector.shape_cast %142 : vector<1x98xf32> to vector<1x1x98xf32>
    %cst_35 = arith.constant dense<0.000000e+00> : vector<1xf32>
    %144 = vector.multi_reduction <add>, %143, %cst_35 [1, 2] : vector<1x1x98xf32> to vector<1xf32>
    %145 = vector.shape_cast %144 : vector<1xf32> to vector<1x1x1xf32>
    %146 = vector.extract %145[0, 0, 0] : f32 from vector<1x1x1xf32>
    %cst_36 = arith.constant 5.000000e-01 : f32
    %147 = arith.mulf %cst_36, %146 : f32
    %148 = vector.extract_strided_slice %140 {offsets = [0, 0], sizes = [1, 98], strides = [1, 1]} : vector<5x98xf32> to vector<1x98xf32>
    %149 = vector.extract_strided_slice %16 {offsets = [0, 0], sizes = [1, 98], strides = [1, 1]} : vector<4x98xf32> to vector<1x98xf32>
    %150 = arith.subf %148, %149 : vector<1x98xf32>
    %151 = arith.mulf %150, %150 : vector<1x98xf32>
    %152 = vector.extract_strided_slice %140 {offsets = [1, 0], sizes = [1, 98], strides = [1, 1]} : vector<5x98xf32> to vector<1x98xf32>
    %153 = vector.extract_strided_slice %16 {offsets = [1, 0], sizes = [1, 98], strides = [1, 1]} : vector<4x98xf32> to vector<1x98xf32>
    %154 = arith.subf %152, %153 : vector<1x98xf32>
    %155 = arith.mulf %154, %154 : vector<1x98xf32>
    %156 = arith.addf %151, %155 : vector<1x98xf32>
    %157 = vector.extract_strided_slice %140 {offsets = [2, 0], sizes = [1, 98], strides = [1, 1]} : vector<5x98xf32> to vector<1x98xf32>
    %158 = math.sqrt %157 : vector<1x98xf32>
    %159 = vector.extract_strided_slice %16 {offsets = [2, 0], sizes = [1, 98], strides = [1, 1]} : vector<4x98xf32> to vector<1x98xf32>
    %160 = math.sqrt %159 : vector<1x98xf32>
    %161 = arith.subf %158, %160 : vector<1x98xf32>
    %162 = arith.mulf %161, %161 : vector<1x98xf32>
    %163 = vector.extract_strided_slice %140 {offsets = [3, 0], sizes = [1, 98], strides = [1, 1]} : vector<5x98xf32> to vector<1x98xf32>
    %164 = math.sqrt %163 : vector<1x98xf32>
    %165 = vector.extract_strided_slice %16 {offsets = [3, 0], sizes = [1, 98], strides = [1, 1]} : vector<4x98xf32> to vector<1x98xf32>
    %166 = math.sqrt %165 : vector<1x98xf32>
    %167 = arith.subf %164, %166 : vector<1x98xf32>
    %168 = arith.mulf %167, %167 : vector<1x98xf32>
    %169 = arith.addf %162, %168 : vector<1x98xf32>
    %170 = arith.addf %156, %169 : vector<1x98xf32>
    %cst_37 = arith.constant 0.000000e+00 : f32
    %171 = vector.broadcast %cst_37 : f32 to vector<1x98xf32>
    %172 = arith.select %9, %170, %171 : vector<1x98xi1>, vector<1x98xf32>
    %173 = vector.shape_cast %172 : vector<1x98xf32> to vector<1x1x98xf32>
    %cst_38 = arith.constant dense<0.000000e+00> : vector<1xf32>
    %174 = vector.multi_reduction <add>, %173, %cst_38 [1, 2] : vector<1x1x98xf32> to vector<1xf32>
    %175 = vector.shape_cast %174 : vector<1xf32> to vector<1x1x1xf32>
    %176 = vector.extract %175[0, 0, 0] : f32 from vector<1x1x1xf32>
    %cst_39 = arith.constant 5.000000e+00 : f32
    %177 = arith.mulf %cst_39, %176 : f32
    %178 = vector.extract_strided_slice %140 {offsets = [4, 0], sizes = [1, 98], strides = [1, 1]} : vector<5x98xf32> to vector<1x98xf32>
    %179 = arith.subf %137, %178 : vector<1x98xf32>
    %180 = arith.mulf %179, %179 : vector<1x98xf32>
    %cst_40 = arith.constant 0.000000e+00 : f32
    %181 = vector.broadcast %cst_40 : f32 to vector<1x98xf32>
    %182 = arith.select %9, %180, %181 : vector<1x98xi1>, vector<1x98xf32>
    %183 = vector.shape_cast %182 : vector<1x98xf32> to vector<1x1x98xf32>
    %cst_41 = arith.constant dense<0.000000e+00> : vector<1xf32>
    %184 = vector.multi_reduction <add>, %183, %cst_41 [1, 2] : vector<1x1x98xf32> to vector<1xf32>
    %185 = vector.shape_cast %184 : vector<1xf32> to vector<1x1x1xf32>
    %186 = vector.extract %185[0, 0, 0] : f32 from vector<1x1x1xf32>
    %187 = tpu.iota {dimensions = array<i32: 0>} : vector<4x128xi32>
    %c0_i32 = arith.constant 0 : i32
    %188 = vector.broadcast %c0_i32 : i32 to vector<4x128xi32>
    %189 = arith.cmpi eq, %187, %188 : vector<4x128xi32>
    %c1_i32 = arith.constant 1 : i32
    %190 = vector.broadcast %c1_i32 : i32 to vector<4x128xi32>
    %191 = arith.cmpi eq, %187, %190 : vector<4x128xi32>
    %c2_i32 = arith.constant 2 : i32
    %192 = vector.broadcast %c2_i32 : i32 to vector<4x128xi32>
    %193 = arith.cmpi eq, %187, %192 : vector<4x128xi32>
    %194 = vector.broadcast %177 : f32 to vector<4x128xf32>
    %195 = vector.broadcast %186 : f32 to vector<4x128xf32>
    %196 = arith.select %193, %194, %195 : vector<4x128xi1>, vector<4x128xf32>
    %197 = vector.broadcast %147 : f32 to vector<4x128xf32>
    %198 = arith.select %191, %197, %196 : vector<4x128xi1>, vector<4x128xf32>
    %199 = vector.broadcast %29 : f32 to vector<4x128xf32>
    %200 = arith.select %189, %199, %198 : vector<4x128xi1>, vector<4x128xf32>
    %c0_42 = arith.constant 0 : index
    %c0_43 = arith.constant 0 : index
    %c0_44 = arith.constant 0 : index
    %201 = vector.load %arg5[%c0_42, %c0_43, %c0_44] : memref<1x4x128xf32, #tpu.memory_space<vmem>>, vector<1x4x128xf32>
    %202 = vector.shape_cast %201 : vector<1x4x128xf32> to vector<4x128xf32>
    %203 = vector.shape_cast %200 : vector<4x128xf32> to vector<1x4x128xf32>
    tpu.vector_store %arg5[%c0_42, %c0_43, %c0_44], %203 {strides = array<i32>} : memref<1x4x128xf32, #tpu.memory_space<vmem>>, vector<1x4x128xf32>,
    return
  }
  func.func @transform_0(%arg0: i32) -> (i32, i32) {
    %c0_i32 = arith.constant 0 : i32
    %c0_i32_0 = arith.constant 0 : i32
    return %arg0, %c0_i32 : i32, i32
  }
  func.func @transform_1(%arg0: i32) -> (i32, i32) {
    %c0_i32 = arith.constant 0 : i32
    %c0_i32_0 = arith.constant 0 : i32
    return %arg0, %c0_i32 : i32, i32
  }
  func.func @transform_2(%arg0: i32) -> (i32, i32) {
    %c0_i32 = arith.constant 0 : i32
    %c0_i32_0 = arith.constant 0 : i32
    return %arg0, %c0_i32 : i32, i32
  }
  func.func @transform_3(%arg0: i32) -> (i32, i32) {
    %c0_i32 = arith.constant 0 : i32
    %c0_i32_0 = arith.constant 0 : i32
    return %c0_i32, %arg0 : i32, i32
  }
  func.func @transform_4(%arg0: i32) -> (i32, i32, i32) {
    %c0_i32 = arith.constant 0 : i32
    %c0_i32_0 = arith.constant 0 : i32
    %c0_i32_1 = arith.constant 0 : i32
    return %arg0, %c0_i32, %c0_i32_0 : i32, i32, i32
  }
}

</mosaic_0001>

<bundles_post_ra>
// kernel: run.1
= control target key start
LH: loop header
LB: loop body
LE: loop exit
PB: predicated region body
PF: predicated region fallthrough
CT: control target
= control target key end

     0   :  { %v17_v53 = vlaneseq  ;;  %vm166_vm2 = vcmask 1045504   ;;  %vm195_vm4 = vcmask 794624   ;;  %vm181_vm5 = vcmask 801792   ;;  %s687_s1 = inlined_call_operand.vmem [shape: f32[98,4], index: 1, kind: input, shape index: {}]   ;;  %s688_s0 = inlined_call_operand.vmem [shape: f32[98,30], index: 0, kind: input, shape index: {}]   ;;  %s689_s2 = inlined_call_operand.vmem [shape: f32[98,20], index: 2, kind: input, shape index: {}]   ;;  %s690_s3 = inlined_call_operand.vmem [shape: f32[1,98], index: 3, kind: input, shape index: {}]   ;;  %s691_s4 = inlined_call_operand.vmem [shape: f32[1,4,128], index: 4, kind: output, shape index: {}]  }
   0x1   :  { %v73_v0 = vld [vmem:[%s687_s1] sm:$0xff]  ;;  %v74_v3 = vld [vmem:[%s687_s1 + $0x8] sm:$0xff]  ;;  %v75_v6 = vld [vmem:[%s687_s1 + $0x10] sm:$0xff]  ;;  %vm185_vm6 = vcmask 797696  }
   0x2   :  { %v28_v1 = vld [vmem:[%s688_s0] sm:$0xff]  ;;  %86 = vxpose.xlu1.b32.start [1/13] (short) (narrow) %v73_v0, 8  ;;  %v29_v4 = vld [vmem:[%s688_s0 + $0x8] sm:$0xff]  ;;  %v30_v7 = vld [vmem:[%s688_s0 + $0x10] sm:$0xff]  ;;  %v626_v0 = vand.u32 127, %v17_v53 }
   0x3   :  { %41 = vxpose.xlu0.b32.start [1/13] (short) (narrow) %v28_v1, 32  ;;  %v118_v2 = vld [vmem:[%s689_s2] sm:$0xff]  ;;  %v119_v5 = vld [vmem:[%s689_s2 + $0x8] sm:$0xff]  ;;  %v120_v8 = vld [vmem:[%s689_s2 + $0x10] sm:$0xff] }
   0x4   :  { %131 = vxpose.xlu2.b32.start [1/13] (short) (narrow) %v118_v2, 24  ;;  %v76_v9 = vld [vmem:[%s687_s1 + $0x18] sm:$0xff]  ;;  %v77_v12 = vld [vmem:[%s687_s1 + $0x20] sm:$0xff]  ;;  %v78_v15 = vld [vmem:[%s687_s1 + $0x28] sm:$0xff]  ;;  %vm22_vm0 = vcmp.lt.s32.totalorder %v626_v0, 98 }
   0x5   :  { %v31_v10 = vld [vmem:[%s688_s0 + $0x18] sm:$0xff]  ;;  %v32_v13 = vld [vmem:[%s688_s0 + $0x20] sm:$0xff]  ;;  %v33_v16 = vld [vmem:[%s688_s0 + $0x28] sm:$0xff] }
   0x6   :  { %v121_v11 = vld [vmem:[%s689_s2 + $0x18] sm:$0xff]  ;;  %v122_v14 = vld [vmem:[%s689_s2 + $0x20] sm:$0xff]  ;;  %v123_v17 = vld [vmem:[%s689_s2 + $0x28] sm:$0xff] }
   0x7   :  { %v79_v18 = vld [vmem:[%s687_s1 + $0x30] sm:$0xff]  ;;  %v80_v21 = vld [vmem:[%s687_s1 + $0x38] sm:$0xff]  ;;  %v81_v24 = vld [vmem:[%s687_s1 + $0x40] sm:$0xff] }
   0x8   :  { %v34_v19 = vld [vmem:[%s688_s0 + $0x30] sm:$0xff]  ;;  %v35_v22 = vld [vmem:[%s688_s0 + $0x38] sm:$0xff]  ;;  %v36_v25 = vld [vmem:[%s688_s0 + $0x40] sm:$0xff] }
   0x9   :  { %v124_v20 = vld [vmem:[%s689_s2 + $0x30] sm:$0xff]  ;;  %v125_v23 = vld [vmem:[%s689_s2 + $0x38] sm:$0xff]  ;;  %v126_v26 = vld [vmem:[%s689_s2 + $0x40] sm:$0xff] }
   0xa   :  { %87 = vxpose.xlu1.b32.cont [2/13] (short) (narrow) %v74_v3, 8  ;;  %v82_v27 = vld [vmem:[%s687_s1 + $0x48] sm:$0xff]  ;;  %v83_v30 = vld [vmem:[%s687_s1 + $0x50] sm:$0xff]  ;;  %v84_v33 = vld [vmem:[%s687_s1 + $0x58] sm:$0xff] }
   0xb   :  { %42 = vxpose.xlu0.b32.cont [2/13] (short) (narrow) %v29_v4, 32  ;;  %v37_v28 = vld [vmem:[%s688_s0 + $0x48] sm:$0xff]  ;;  %v38_v31 = vld [vmem:[%s688_s0 + $0x50] sm:$0xff]  ;;  %v39_v34 = vld [vmem:[%s688_s0 + $0x58] sm:$0xff] }
   0xc   :  { %132 = vxpose.xlu2.b32.cont [2/13] (short) (narrow) %v119_v5, 24  ;;  %v127_v29 = vld [vmem:[%s689_s2 + $0x48] sm:$0xff]  ;;  %v128_v32 = vld [vmem:[%s689_s2 + $0x50] sm:$0xff]  ;;  %v129_v35 = vld [vmem:[%s689_s2 + $0x58] sm:$0xff] }
   0xd   :  { %v85_v36 = vld [vmem:[%s687_s1 + $0x60] sm:$0x3] }
   0xe   :  { %v40_v37 = vld [vmem:[%s688_s0 + $0x60] sm:$0x3] }
   0xf   :  { %v130_v38 = vld [vmem:[%s689_s2 + $0x60] sm:$0x3] }
  0x10   :  { %v631_v5 = vld [vmem:[%s690_s3] sm:$0x1] }
  0x11   :  { %vm26_vm1 = vcmp.le.f32.partialorder %v631_v5, 0.5  ;;  %vm24_vm11 = vcmp.gt.f32.partialorder %v631_v5, 0.5 }
  0x12   :  { %88 = vxpose.xlu1.b32.cont [3/13] (short) (narrow) %v75_v6, 8  ;;  %vm27_vm3 = vmand %vm22_vm0, %vm26_vm1 }
  0x13   :  { %43 = vxpose.xlu0.b32.cont [3/13] (short) (narrow) %v30_v7, 32  ;;  %vm659_vm1 = vmand %vm22_vm0, %vm24_vm11 }
  0x14   :  { %133 = vxpose.xlu2.b32.cont [3/13] (short) (narrow) %v120_v8, 24 }
  0x1a   :  { %89 = vxpose.xlu1.b32.cont [4/13] (short) (narrow) %v76_v9, 8 }
  0x1b   :  { %44 = vxpose.xlu0.b32.cont [4/13] (short) (narrow) %v31_v10, 32 }
  0x1c   :  { %134 = vxpose.xlu2.b32.cont [4/13] (short) (narrow) %v121_v11, 24 }
  0x22   :  { %90 = vxpose.xlu1.b32.cont [5/13] (short) (narrow) %v77_v12, 8 }
  0x23   :  { %45 = vxpose.xlu0.b32.cont [5/13] (short) (narrow) %v32_v13, 32 }
  0x24   :  { %135 = vxpose.xlu2.b32.cont [5/13] (short) (narrow) %v122_v14, 24 }
  0x2a   :  { %91 = vxpose.xlu1.b32.cont [6/13] (short) (narrow) %v78_v15, 8 }
  0x2b   :  { %46 = vxpose.xlu0.b32.cont [6/13] (short) (narrow) %v33_v16, 32 }
  0x2c   :  { %136 = vxpose.xlu2.b32.cont [6/13] (short) (narrow) %v123_v17, 24 }
  0x32   :  { %92 = vxpose.xlu1.b32.cont [7/13] (short) (narrow) %v79_v18, 8 }
  0x33   :  { %47 = vxpose.xlu0.b32.cont [7/13] (short) (narrow) %v34_v19, 32 }
  0x34   :  { %137 = vxpose.xlu2.b32.cont [7/13] (short) (narrow) %v124_v20, 24 }
  0x3a   :  { %93 = vxpose.xlu1.b32.cont [8/13] (short) (narrow) %v80_v21, 8 }
  0x3b   :  { %48 = vxpose.xlu0.b32.cont [8/13] (short) (narrow) %v35_v22, 32 }
  0x3c   :  { %138 = vxpose.xlu2.b32.cont [8/13] (short) (narrow) %v125_v23, 24 }
  0x42   :  { %94 = vxpose.xlu1.b32.cont [9/13] (short) (narrow) %v81_v24, 8 }
  0x43   :  { %49 = vxpose.xlu0.b32.cont [9/13] (short) (narrow) %v36_v25, 32 }
  0x44   :  { %139 = vxpose.xlu2.b32.cont [9/13] (short) (narrow) %v126_v26, 24 }
  0x4a   :  { %95 = vxpose.xlu1.b32.cont [10/13] (short) (narrow) %v82_v27, 8 }
  0x4b   :  { %50 = vxpose.xlu0.b32.cont [10/13] (short) (narrow) %v37_v28, 32 }
  0x4c   :  { %140 = vxpose.xlu2.b32.cont [10/13] (short) (narrow) %v127_v29, 24 }
  0x52   :  { %96 = vxpose.xlu1.b32.cont [11/13] (short) (narrow) %v83_v30, 8 }
  0x53   :  { %51 = vxpose.xlu0.b32.cont [11/13] (short) (narrow) %v38_v31, 32 }
  0x54   :  { %141 = vxpose.xlu2.b32.cont [11/13] (short) (narrow) %v128_v32, 24 }
  0x5a   :  { %97 = vxpose.xlu1.b32.cont [12/13] (short) (narrow) %v84_v33, 8 }
  0x5b   :  { %52 = vxpose.xlu0.b32.cont [12/13] (short) (narrow) %v39_v34, 32 }
  0x5c   :  { %142 = vxpose.xlu2.b32.cont [12/13] (short) (narrow) %v129_v35, 24 }
  0x62   :  { %98 = vxpose.xlu1.b32.end [13/13] (short) (narrow) %v85_v36, 8 }
  0x63   :  { %53 = vxpose.xlu0.b32.end [13/13] (short) (narrow) %v40_v37, 32 }
  0x64   :  { %143 = vxpose.xlu2.b32.end [13/13] (short) (narrow) %v130_v38, 24 }
  0x9d   :  { %v147_v49 = vpop.trf.xlu2 }
  0xa5   :  { %v148_v13 = vpop.trf.xlu2 }
  0xa6   :  { %v612_v39 = vpop.trf.xlu1 }
  0xa7   :  { %v614_v40 = vpop.trf.xlu0  ;;  %v206_v41 = vmul.f32 0.14285715, %v612_v39  ;;  %v207_v42 = vmul.f32 0.5, %v612_v39 }
  0xa8   :  { %v219_v43 = vmul.f32 0.5, %v614_v40  ;;  %v218_v45 = vmul.f32 0.14285715, %v614_v40  ;;  %v255_v8 = vmul.f32 %v614_v40, %v614_v40 }
  0xa9   :  { %v209_v44 = vrot.slane %v207_v42, 2 }
  0xaa   :  { %v221_v46 = vrot.slane %v219_v43, 2 }
  0xab   :  { %v211_v47 = vsub.f32 %v206_v41, %v209_v44  ;;  %v212_v48 = vadd.f32 %v209_v44, %v206_v41 }
  0xac   :  { %v223_v50 = vsub.f32 %v218_v45, %v221_v46  ;;  %v224_v51 = vadd.f32 %v221_v46, %v218_v45 }
  0xad   :  { %v213_v52 = vsub.f32 %v212_v48, %v211_v47  ;;  %v149_v43 = vpop.trf.xlu2 }
  0xae   :  { %v225_v54 = vsub.f32 %v224_v51, %v223_v50  ;;  %v230_v55 = vmin.f32 %v212_v48, %v224_v51  ;;  %v231_v56 = vmax.f32 %v211_v47, %v223_v50  ;;  %v273_v6 = vrot.slane %v224_v51, 5 }
  0xaf   :  { %v620_v57 = vpop.trf.xlu0  ;;  %v215_v58 = vrot.slane %v213_v52, 1  ;;  %v277_v7 = vrot.slane %v223_v50, 5 }
  0xb0   :  { %v256_v59 = vmul.f32 %v620_v57, %v620_v57  ;;  %v227_v60 = vrot.slane %v225_v54, 1  ;;  %v232_v61 = vsub.f32 %v230_v55, %v231_v56  ;;  %v261_v62 = vmul.f32 0.5, %v620_v57 }
  0xb1   :  { %v217_v63 = vmul.f32 %v215_v58, %v213_v52  ;;  %v275_v20 = vmin.f32 %v212_v48, %v273_v6  ;;  %v279_v21 = vmax.f32 %v211_v47, %v277_v7  ;;  %v167_v27 = vrot.slane %v620_v57, 2 }
  0xb2   :  { %v258_v1 = vrot.slane %v256_v59, 5  ;;  %v229_v2 = vmul.f32 %v227_v60, %v225_v54  ;;  %v233_v3 = vmax.f32 %v232_v61, 0.0  ;;  %v263_v4 = vrot.slane %v261_v62, 2 }
  0xb3   :  { %v280_v29 = vsub.f32 %v275_v20, %v279_v21 }
  0xb4   :  { %v235_v9 = vrot.slane %v233_v3, 1  ;;  %v265_v10 = vsub.f32 %v218_v45, %v263_v4  ;;  %v266_v11 = vadd.f32 %v263_v4, %v218_v45  ;;  %v238_v12 = vadd.f32 %v229_v2, %v217_v63 }
  0xb5   :  { %v260_v14 = vadd.f32 %v258_v1, %v255_v8  ;;  %v281_v38 = vmax.f32 %v280_v29, 0.0 }
  0xb6   :  { %v637_v15 = vmul.f32 %v235_v9, %v233_v3  ;;  %v267_v16 = vsub.f32 %v266_v11, %v265_v10  ;;  %v283_v17 = vrot.slane %v266_v11, 5  ;;  %v287_v18 = vrot.slane %v265_v10, 5 }
  0xb7   :  { %v59_v19 = vpop.trf.xlu0  ;;  %v327_v28 = vrot.slane %v260_v14, 4 }
  0xb8   :  { %v168_v22 = vrot.slane %v59_v19, 2  ;;  %v640_v23 = vsub.f32 %v238_v12, %v637_v15  ;;  %v269_v24 = vrot.slane %v267_v16, 1  ;;  %v285_v25 = vmin.f32 %v212_v48, %v283_v17 }
  0xb9   :  { %v289_v26 = vmax.f32 %v211_v47, %v287_v18  ;;  %v329_v35 = vsel %vm27_vm3, %v327_v28, 0.0  ;;  %vm369_vm3 = vcmp.eq.f32.partialorder %v612_v39, inf }
  0xba   :  { %459 = vrcp.f32 %v640_v23  ;;  %v271_v30 = vmul.f32 %v269_v24, %v225_v54  ;;  %v169_v32 = vsel %vm166_vm2, %v167_v27, %v168_v22  ;;  %v330_v45 = vsel %vm195_vm4, %v329_v35, 0.0 }
  0xbb   :  { %v290_v31 = vsub.f32 %v285_v25, %v289_v26  ;;  %v175_v36 = vsub.f32 %v147_v49, %v169_v32  ;;  %v251_v7 = vand.u32 2147483648, %v640_v23  ;;  %vm245_vm8 = vweird.f32 %v640_v23 }
  0xbc   :  { %v297_v34 = vrot.slane %v271_v30, 5  ;;  %v249_v9 = vand.u32 2147483647, %v640_v23  ;;  %v322_v35 = vrot.slane %v614_v40, 3 }
  0xbd   :  { %v291_v33 = vmax.f32 %v290_v31, 0.0  ;;  %v178_v51 = vmul.f32 %v175_v36, %v175_v36  ;;  %v252_v18 = vor.u32 1.1754944e-38, %v251_v7 }
  0xbe   :  { %v299_v48 = vadd.f32 %v297_v34, %v217_v63  ;;  %vm250_vm12 = vcmp.eq.f32.partialorder %v249_v9, 8.507059e+37 }
  0xbf   :  { %v60_v37 = vpop.trf.xlu0  ;;  %v293_v41 = vrot.slane %v291_v33, 1  ;;  %v182_v59 = vsel %vm181_vm5, %v178_v51, 0.0  ;;  %v469_v33 = vmov 0  }
  0xc0   :  { %v170_v42 = vrot.slane %v60_v37, 2  ;;  %v460_v44 = vpop.eup %459 }
  0xc1   :  { %v241_v46 = vmul.f32 %v460_v44, %v640_v23  ;;  %v295_v47 = vmul.f32 %v293_v41, %v281_v38  ;;  %vm246_vm7 = vweird.f32 %v460_v44 }
  0xc2   :  { %v171_v50 = vsel %vm166_vm2, %v168_v22, %v170_v42  ;;  %331 = vadd.xlane.f32.xlu1 %v330_v45  ;;  %v177_v54 = vsub.f32 %v149_v43, %v170_v42  ;;  %vm247_vm9 = vmor %vm245_vm8, %vm246_vm7 }
  0xc3   :  { %v176_v52 = vsub.f32 %v148_v13, %v171_v50  ;;  %v300_v55 = vsub.f32 %v299_v48, %v295_v47  ;;  %v242_v49 = vsub.f32 1.0, %v241_v46 }
  0xc4   :  { %v180_v58 = vmul.f32 %v177_v54, %v177_v54 }
  0xc5   :  { %v179_v56 = vmul.f32 %v176_v52, %v176_v52  ;;  %461 = vrcp.f32 %v300_v55  ;;  %v243_v1 = vmul.f32 %v460_v44, %v242_v49  ;;  %v312_v11 = vand.u32 2147483648, %v300_v55 }
  0xc6   :  { %v186_v61 = vsel %vm185_vm6, %v180_v58, 0.0  ;;  %463 = vrsqrt.f32 %v612_v39  ;;  %v310_v16 = vand.u32 2147483647, %v300_v55  ;;  %vm306_vm13 = vweird.f32 %v300_v55 }
  0xc7   :  { %v183_v60 = vsel %vm181_vm5, %v179_v56, 0.0  ;;  %v244_v4 = vadd.f32 %v460_v44, %v243_v1  ;;  %v313_v22 = vor.u32 1.1754944e-38, %v312_v11  ;;  %vm371_vm5 = vcmp.eq.f32.partialorder %v612_v39, 0.0 }
  0xc8   :  { %v184_v62 = vadd.f32 %v183_v60, %v182_v59  ;;  %vm311_vm15 = vcmp.eq.f32.partialorder %v310_v16, 8.507059e+37 }
  0xc9   :  { %v248_v13 = vsel %vm247_vm9, %v460_v44, %v244_v4 }
  0xca   :  { %v187_v2 = vadd.f32 %v186_v61, %v184_v62  ;;  %v253_v21 = vsel %vm250_vm12, %v252_v18, %v248_v13  ;;  %v372_v61 = vand.u32 2147483648, %v612_v39  ;;  %v342_v62 = vrot.slane %v612_v39, 3 }
  0xcb   :  { %v462_v63 = vpop.eup %461  ;;  %v254_v28 = vmul.f32 %v253_v21, %v637_v15 }
  0xcc   :  { %v188_v3 = vrot.slane %v187_v2, 4  ;;  %v302_v6 = vmul.f32 %v462_v63, %v300_v55  ;;  %vm307_vm10 = vweird.f32 %v462_v63  ;;  %v464_v17 = vpop.eup %463 }
  0xcd   :  { %vm308_vm14 = vmor %vm306_vm13, %vm307_vm10  ;;  %v363_v26 = vmul.f32 %v464_v17, %v612_v39 }
  0xce   :  { %v189_v8 = vadd.f32 %v188_v3, %v187_v2  ;;  %v303_v10 = vsub.f32 1.0, %v302_v6 }
  0xcf   :  { %v364_v32 = vmul.f32 %v464_v17, %v363_v26 }
  0xd0   :  { %v190_v12 = vrot.slane %v189_v8, 2  ;;  %v304_v14 = vmul.f32 %v462_v63, %v303_v10 }
  0xd1   :  { %v365_v36 = vmul.f32 0.5, %v364_v32 }
  0xd2   :  { %v191_v19 = vadd.f32 %v190_v12, %v189_v8  ;;  %v305_v20 = vadd.f32 %v462_v63, %v304_v14 }
  0xd3   :  { %v366_v43 = vsub.f32 1.5, %v365_v36 }
  0xd4   :  { %v192_v23 = vrot.slane %v191_v19, 1  ;;  %v309_v24 = vsel %vm308_vm14, %v462_v63, %v305_v20 }
  0xd5   :  { %v314_v27 = vsel %vm311_vm15, %v313_v22, %v309_v24 }
  0xd6   :  { %v193_v5 = vadd.f32 %v192_v23, %v191_v19  ;;  %v315_v29 = vmul.f32 %v314_v27, %v295_v47  ;;  %v367_v47 = vmul.f32 %v464_v17, %v366_v43 }
  0xd8   :  { %v194_v30 = vsel %vm659_vm1, %v193_v5, 0.0  ;;  %vm316_vm2 = vcmp.gt.f32.partialorder %v315_v29, %v254_v28 }
  0xd9   :  { %v196_v31 = vsel %vm195_vm4, %v194_v30, 0.0  ;;  %v318_v0 = vsel %vm316_vm2, 1, %v469_v33  ;;  %v317_v41 = vsel %vm316_vm2, %v315_v29, %v254_v28 }
  0xda   :  { %197 = vadd.xlane.f32.xlu0 %v196_v31  ;;  %v319_v34 = vperm.slane %v318_v0, 0 }
  0xdc   :  { %vm320_vm0 = vcmp.eq.s32.totalorder %v319_v34, 1 }
  0xdd   :  { %v324_v37 = vsel %vm320_vm0, %v614_v40, %v322_v35  ;;  %v325_v15 = vsel %vm320_vm0, %v620_v57, %v322_v35  ;;  %v368_v57 = vmul.f32 %v367_v47, %v612_v39 }
  0xde   :  { %465 = vrsqrt.f32 %v324_v37  ;;  %v417_v38 = vrot.slane %v325_v15, 1  ;;  %v344_v3 = vsub.f32 %v324_v37, %v342_v62  ;;  %vm357_vm6 = vcmp.eq.f32.partialorder %v324_v37, inf }
  0xdf   :  { %467 = vrsqrt.f32 %v325_v15  ;;  %v370_v58 = vsel %vm369_vm3, %v612_v39, %v368_v57  ;;  %v360_v4 = vand.u32 2147483648, %v324_v37  ;;  %vm359_vm7 = vcmp.eq.f32.partialorder %v324_v37, 0.0 }
  0xe0   :  { %v419_v42 = vsub.f32 %v317_v41, %v417_v38  ;;  %v373_v63 = vsel %vm371_vm5, %v372_v61, %v370_v58  ;;  %vm386_vm8 = vcmp.eq.f32.partialorder %v325_v15, inf  ;;  %v389_v8 = vand.u32 2147483648, %v325_v15 }
  0xe1   :  { %v375_v10 = vrot.slane %v373_v63, 3  ;;  %vm388_vm9 = vcmp.eq.f32.partialorder %v325_v15, 0.0  ;;  %v345_v13 = vmul.f32 %v344_v3, %v344_v3 }
  0xe2   :  { %v420_v44 = vmul.f32 %v419_v42, %v419_v42 }
  0xe3   :  { %v347_v17 = vrot.slane %v345_v13, 1 }
  0xe4   :  { %v466_v45 = vpop.eup %465  ;;  %v421_v46 = vsel %vm659_vm1, %v420_v44, 0.0 }
  0xe5   :  { %v468_v48 = vpop.eup %467  ;;  %v422_v50 = vsel %vm195_vm4, %v421_v46, 0.0  ;;  %v351_v51 = vmul.f32 %v466_v45, %v324_v37  ;;  %v349_v21 = vadd.f32 %v347_v17, %v345_v13 }
  0xe6   :  { %v380_v52 = vmul.f32 %v468_v48, %v325_v15  ;;  %423 = vadd.xlane.f32.xlu1 %v422_v50 }
  0xe7   :  { %v352_v40 = vmul.f32 %v466_v45, %v351_v51 }
  0xe8   :  { %v381_v54 = vmul.f32 %v468_v48, %v380_v52 }
  0xe9   :  { %v353_v55 = vmul.f32 0.5, %v352_v40 }
  0xea   :  { %v382_v49 = vmul.f32 0.5, %v381_v54  ;;  %v433_v54 = vshrl.u32 %v17_v53, 7 }
  0xeb   :  { %v354_v56 = vsub.f32 1.5, %v353_v55 }
  0xec   :  { %v383_v59 = vsub.f32 1.5, %v382_v49  ;;  %vm435_vm10 = vcmp.eq.s32.totalorder %v433_v54, 1  ;;  %vm434_vm11 = vcmp.eq.s32.totalorder %v433_v54, 0 }
  0xed   :  { %v355_v60 = vmul.f32 %v466_v45, %v354_v56 }
  0xee   :  { %v384_v1 = vmul.f32 %v468_v48, %v383_v59 }
  0xef   :  { %v356_v2 = vmul.f32 %v355_v60, %v324_v37 }
  0xf0   :  { %v385_v6 = vmul.f32 %v384_v1, %v325_v15 }
  0xf1   :  { %v358_v7 = vsel %vm357_vm6, %v324_v37, %v356_v2 }
  0xf2   :  { %v361_v9 = vsel %vm359_vm7, %v360_v4, %v358_v7  ;;  %v387_v11 = vsel %vm386_vm8, %v325_v15, %v385_v6 }
  0xf3   :  { %v390_v12 = vsel %vm388_vm9, %v389_v8, %v387_v11  ;;  %v377_v14 = vsub.f32 %v361_v9, %v375_v10 }
  0xf4   :  { %v391_v16 = vsub.f32 %v390_v12, %v375_v10 }
  0xf5   :  { %v378_v18 = vmul.f32 %v377_v14, %v377_v14 }
  0xf6   :  { %v392_v39 = vmul.f32 %v391_v16, %v391_v16 }
  0xf8   :  { %v394_v19 = vrot.slane %v392_v39, 1 }
  0xfa   :  { %v396_v20 = vadd.f32 %v394_v19, %v378_v18 }
  0xfc   :  { %v398_v22 = vrot.slane %v396_v20, 2 }
  0xfe   :  { %v400_v23 = vadd.f32 %v398_v22, %v349_v21 }
 0x100   :  { %v402_v24 = vrot.slane %v400_v23, 5 }
 0x102   :  { %v404_v26 = vsel %vm659_vm1, %v402_v24, 0.0 }
 0x103   :  { %v405_v27 = vsel %vm195_vm4, %v404_v26, 0.0  ;;  %vm436_vm4 = vcmp.eq.s32.totalorder %v433_v54, 2 }
 0x104   :  { %406 = vadd.xlane.f32.xlu2 %v405_v27 }
 0x135   :  { %v332_v5 = vpop.xlane.xlu1 %331 }
 0x136   :  { %v333_v28 = vrot.slane %v332_v5, 4 }
 0x138   :  { %v334_v29 = vadd.f32 %v333_v28, %v332_v5 }
 0x13a   :  { %v335_v30 = vrot.slane %v334_v29, 2 }
 0x13c   :  { %v336_v0 = vadd.f32 %v335_v30, %v334_v29 }
 0x13e   :  { %v337_v36 = vrot.slane %v336_v0, 1 }
 0x140   :  { %v338_v38 = vadd.f32 %v337_v36, %v336_v0 }
 0x14d   :  { %v198_v31 = vpop.xlane.xlu0 %197 }
 0x14e   :  { %v199_v32 = vrot.slane %v198_v31, 4 }
 0x150   :  { %v200_v33 = vadd.f32 %v199_v32, %v198_v31 }
 0x152   :  { %v201_v34 = vrot.slane %v200_v33, 2 }
 0x154   :  { %v202_v35 = vadd.f32 %v201_v34, %v200_v33 }
 0x156   :  { %v203_v37 = vrot.slane %v202_v35, 1 }
 0x158   :  { %v204_v15 = vadd.f32 %v203_v37, %v202_v35 }
 0x159   :  { %v424_v25 = vpop.xlane.xlu1 %423 }
 0x15a   :  { %449 = vpush %v204_v15  ;;  %v425_v41 = vrot.slane %v424_v25, 4 }
 0x15b   :  { %451 = vpush %v338_v38 }
 0x15c   :  { %v426_v42 = vadd.f32 %v425_v41, %v424_v25 }
 0x15e   :  { %v427_v43 = vrot.slane %v426_v42, 2 }
 0x160   :  { %v428_v47 = vadd.f32 %v427_v43, %v426_v42 }
 0x162   :  { %v429_v51 = vrot.slane %v428_v47, 1 }
 0x164   :  { %v430_v57 = vadd.f32 %v429_v51, %v428_v47 }
 0x177   :  { %v407_v44 = vpop.xlane.xlu2 %406 }
 0x178   :  { %v408_v45 = vrot.slane %v407_v44, 4 }
 0x17a   :  { %v409_v46 = vadd.f32 %v408_v45, %v407_v44 }
 0x17c   :  { %v410_v48 = vrot.slane %v409_v46, 2 }
 0x17e   :  { %v411_v50 = vadd.f32 %v410_v48, %v409_v46 }
 0x180   :  { %v412_v52 = vrot.slane %v411_v50, 1 }
 0x182   :  { %v413_v40 = vadd.f32 %v412_v52, %v411_v50 }
 0x184   :  { %453 = vpush %v413_v40 }
 0x185   :  { %455 = vpush %v430_v57 }
 0x18b   :  { %s450_s2 = spop %449 }
 0x18c   :  { %s452_s3 = spop %451  ;;  %v442_v59 = vstv %s450_s2 }
 0x18d   :  { %s340_s15 = smul.f32 0.5, %s452_s3 }
 0x18f   :  { %v440_v56 = vstv %s340_s15 }
 0x1b5   :  { %s454_s16 = spop %453 }
 0x1b6   :  { %s415_s17 = smul.f32 5.0, %s454_s16  ;;  %s456_s18 = spop %455 }
 0x1b7   :  { %v438_v49 = vstv %s456_s18 }
 0x1b8   :  { %v437_v55 = vstv %s415_s17 }
 0x1b9   :  { %v439_v58 = vsel %vm436_vm4, %v437_v55, %v438_v49 }
 0x1ba   :  { %v441_v60 = vsel %vm435_vm10, %v440_v56, %v439_v58 }
 0x1bb   :  { %v443_v61 = vsel %vm434_vm11, %v442_v59, %v441_v60 }
 0x1bc   :  { %444 = vst [vmem:[%s691_s4] sm:$0xf] %v443_v61 }

</bundles_post_ra>
